<compile_context>
chip_gen: v7x
topology: tpu7x:2x2x1
jax: 0.10.0
libtpu: 0.0.40
codegen_flags: <defaults>
</compile_context>

<pallas_src>
import functools

import jax
import jax.numpy as jnp
from jax import lax
from jax.experimental import pallas as pl
from jax.experimental.pallas import tpu as pltpu

EPS = 1e-5  # nn.BatchNorm2d default eps

# 3x3 tap offsets, (dy, dx), row-major — must match the weight repack below.
_OFFSETS = tuple((oy, ox) for oy in (-1, 0, 1) for ox in (-1, 0, 1))


# ----------------------------------------------------------------------------
# in-kernel conv body (shared by both stages)
# ----------------------------------------------------------------------------
def _conv_body(a, mask_ref, w_ref, yraw_ref, stats_ref, *, H, W):
    """3x3 same-padding conv of a channel-major (Cin, M=H*W) f32 activation.

    Taps = lane rolls of the flattened image (XLU slot, essentially free),
    padding handled by multiplying with precomputed 0/1 masks, each tap is one
    small MXU matmul accumulated in f32.  Result is (Cout, M): lane-dense.
    """
    Cin, M = a.shape
    Cout = w_ref.shape[1]

    acc = jnp.zeros((Cout, M), jnp.float32)
    for k, (oy, ox) in enumerate(_OFFSETS):
        s = oy * W + ox
        tap = a if s == 0 else pltpu.roll(a, shift=(-s) % M, axis=1)
        if s != 0:
            tap = tap * mask_ref[k:k + 1, :]       # zero the padding halo
        acc = acc + jnp.dot(w_ref[k], tap.astype(jnp.bfloat16),
                            preferred_element_type=jnp.float32)

    # Per-channel batch-norm partials from the f32 accumulator (lane reduce).
    # TODO(synk): single-pass E[x^2]-E[x]^2 can cancel for large-mean
    # activations; fine at these scales, use Welford if this block scales up.
    s1 = jnp.sum(acc, axis=1, keepdims=True)       # (Cout, 1)
    s2 = jnp.sum(acc * acc, axis=1, keepdims=True)  # (Cout, 1)
    stats_ref[...] = jnp.concatenate([s1, s2], axis=1).reshape(1, Cout, 2)
    yraw_ref[...] = acc.astype(yraw_ref.dtype).reshape(1, Cout, M)


def _conv_kernel(x_ref, mask_ref, w_ref, yraw_ref, stats_ref, *, H, W):
    """Stage 1: raw input -> conv1 -> (bf16 raw output, f32 stats)."""
    _conv_body(x_ref[0], mask_ref, w_ref, yraw_ref, stats_ref, H=H, W=W)


def _bn_relu_conv_kernel(y_ref, sc_ref, sh_ref, mask_ref, w_ref, yraw_ref,
                         stats_ref, *, H, W):
    """Stage 2: BN1 + ReLU fused on the fly, then conv2."""
    a = jnp.maximum(y_ref[0].astype(jnp.float32) * sc_ref[...] + sh_ref[...],
                    0.0)
    _conv_body(a, mask_ref, w_ref, yraw_ref, stats_ref, H=H, W=W)


# ----------------------------------------------------------------------------
# pallas_call builder
# ----------------------------------------------------------------------------
def _conv_stage(x, masks, w9, scale=None, shift=None, *, H, W):
    """One conv stage over a channel-major (N, Cin, M) input; grid = batch.

    If scale/shift are given, the previous stage's BatchNorm + ReLU is applied
    inside the kernel before the conv.  Returns (bf16 raw conv output
    (N, Cout, M), per-image f32 stats (N, Cout, 2))."""
    N, Cin, M = x.shape
    Cout = w9.shape[1]
    assert M == H * W and w9.shape == (9, Cout, Cin)

    data_spec = pl.BlockSpec((1, Cin, M), lambda n: (n, 0, 0))
    mask_spec = pl.BlockSpec((9, M), lambda n: (0, 0))
    w_spec = pl.BlockSpec((9, Cout, Cin), lambda n: (0, 0, 0))
    chan_spec = pl.BlockSpec((Cin, 1), lambda n: (0, 0))

    if scale is None:
        kernel = functools.partial(_conv_kernel, H=H, W=W)
        in_specs = [data_spec, mask_spec, w_spec]
        args = (x, masks, w9)
    else:
        kernel = functools.partial(_bn_relu_conv_kernel, H=H, W=W)
        in_specs = [data_spec, chan_spec, chan_spec, mask_spec, w_spec]
        args = (x, scale, shift, masks, w9)

    return pl.pallas_call(
        kernel,
        grid=(N,),
        in_specs=in_specs,
        out_specs=(
            pl.BlockSpec((1, Cout, M), lambda n: (n, 0, 0)),
            pl.BlockSpec((1, Cout, 2), lambda n: (n, 0, 0)),
        ),
        out_shape=(
            jax.ShapeDtypeStruct((N, Cout, M), jnp.bfloat16),  # lane-dense bf16
            jax.ShapeDtypeStruct((N, Cout, 2), jnp.float32),   # tiny stats
        ),
        compiler_params=pltpu.CompilerParams(
            dimension_semantics=("parallel",)),
    )(*args)


# ----------------------------------------------------------------------------
# XLA-side helpers (tiny; fuse with surrounding ops)
# ----------------------------------------------------------------------------
def _make_shift_masks(H, W):
    """(9, H*W) 0/1 masks: tap k is valid where the shifted pixel is in-bounds."""
    p = jnp.arange(H * W)
    row, col = p // W, p % W
    ms = []
    for oy, ox in _OFFSETS:
        valid = ((row + oy >= 0) & (row + oy < H) &
                 (col + ox >= 0) & (col + ox < W))
        ms.append(valid.astype(jnp.float32))
    return jnp.stack(ms)


def _bn_scale_shift(stats, gamma, beta, count):
    """Fold train-mode batch stats + BN affine into per-channel (C,1) scale/shift."""
    tot = jnp.sum(stats, axis=0)                            # (C, 2)
    mean = tot[:, 0] / count
    var = jnp.maximum(tot[:, 1] / count - mean * mean, 0.0)  # biased (train mode)
    scale = gamma * lax.rsqrt(var + EPS)
    shift = beta - mean * scale
    return scale.reshape(-1, 1), shift.reshape(-1, 1)


@jax.jit
def conv_block_forward(x_nchw, params):
    """Forward of the PyTorch conv_block. Input/Output are NCHW like torch."""
    # conv biases b1/b2 are accepted but unused: a per-channel constant is
    # cancelled exactly by the train-mode BatchNorm mean subtraction.
    w1, _b1, g1, be1, w2, _b2, g2, be2 = params
    N, Cin, H, W = x_nchw.shape
    C1, C2 = w1.shape[-1], w2.shape[-1]
    M = H * W
    count = N * M

    # NCHW -> (N, C, H*W): zero-cost reshape, channel-major / lane-dense.
    x = x_nchw.astype(jnp.float32).reshape(N, Cin, M)
    masks = _make_shift_masks(H, W)                          # (9, M) constants
    # HWIO -> (9, Cout, Cin): tap-major weights, tap order matches _OFFSETS.
    w1_9 = jnp.transpose(w1, (0, 1, 3, 2)).reshape(9, C1, Cin).astype(jnp.bfloat16)
    w2_9 = jnp.transpose(w2, (0, 1, 3, 2)).reshape(9, C2, C1).astype(jnp.bfloat16)

    y1, st1 = _conv_stage(x, masks, w1_9, H=H, W=W)          # conv1
    sc1, sh1 = _bn_scale_shift(st1, g1, be1, count)          # BN1 fold
    y2, st2 = _conv_stage(y1, masks, w2_9, sc1, sh1, H=H, W=W)  # BN1+ReLU+conv2
    sc2, sh2 = _bn_scale_shift(st2, g2, be2, count)          # BN2 fold

    # Final BN2 + ReLU as plain XLA elementwise: fuses with the reshape; a
    # third pallas_call here is pure dispatch overhead at these sizes.
    out = jnp.maximum(y2.astype(jnp.float32) * sc2[None] + sh2[None], 0.0)
    return out.reshape(N, C2, H, W)                          # already NCHW


# ----------------------------------------------------------------------------
# parameter construction + pure-JAX reference
# ----------------------------------------------------------------------------
def init_params(key, in_ch, out_ch):
    """Deterministic synthetic init mirroring the module's parameter shapes."""
    k1, k2, k3, k4 = jax.random.split(key, 4)
    bound1 = 1.0 / jnp.sqrt(in_ch * 9.0)
    bound2 = 1.0 / jnp.sqrt(out_ch * 9.0)
    w1 = jax.random.uniform(k1, (3, 3, in_ch, out_ch), jnp.float32, -bound1, bound1)
    b1 = jax.random.uniform(k2, (out_ch,), jnp.float32, -bound1, bound1)
    w2 = jax.random.uniform(k3, (3, 3, out_ch, out_ch), jnp.float32, -bound2, bound2)
    b2 = jax.random.uniform(k4, (out_ch,), jnp.float32, -bound2, bound2)
    g1 = jnp.ones((out_ch,), jnp.float32)    # BN weight default
    be1 = jnp.zeros((out_ch,), jnp.float32)  # BN bias default
    g2 = jnp.ones((out_ch,), jnp.float32)
    be2 = jnp.zeros((out_ch,), jnp.float32)
    return (w1, b1, g1, be1, w2, b2, g2, be2)


def ref_forward(x_nchw, params):
    """Pure-JAX reference (lax.conv, with the conv biases) for correctness."""
    w1, b1, g1, be1, w2, b2, g2, be2 = params
    x = jnp.transpose(x_nchw, (0, 2, 3, 1)).astype(jnp.float32)

    def conv(x, w, b):
        y = lax.conv_general_dilated(
            x, w, window_strides=(1, 1), padding='SAME',
            dimension_numbers=('NHWC', 'HWIO', 'NHWC'))
        return y + b

    def bn_relu(y, g, be):
        m = jnp.mean(y, axis=(0, 1, 2), keepdims=True)
        v = jnp.mean((y - m) ** 2, axis=(0, 1, 2), keepdims=True)
        return jnp.maximum((y - m) * lax.rsqrt(v + EPS) * g + be, 0.0)

    y = bn_relu(conv(x, w1, b1), g1, be1)
    z = bn_relu(conv(y, w2, b2), g2, be2)
    return jnp.transpose(z, (0, 3, 1, 2))


if __name__ == "__main__":
    key = jax.random.PRNGKey(0)
    kx, kp = jax.random.split(key)

    N, in_ch, out_ch, Hs, Ws = 2, 4, 8, 16, 16
    x = jax.random.normal(kx, (N, in_ch, Hs, Ws), jnp.float32)   # NCHW like torch
    params = init_params(kp, in_ch, out_ch)

    out = jax.block_until_ready(conv_block_forward(x, params))
    ref = jax.block_until_ready(ref_forward(x, params))

    assert out.shape == (N, out_ch, Hs, Ws), out.shape
    err = float(jnp.max(jnp.abs(out - ref)))
    assert jnp.allclose(out, ref, atol=5e-2, rtol=5e-2), err

    print("KERNEL_OK")
</pallas_src>

<mosaic_0001>
module attributes {stable_mosaic.version = 11 : i64} {
  func.func @_conv_kernel(%arg0: i32, %arg1: memref<1x4x256xf32, #tpu.memory_space<vmem>>, %arg2: memref<9x256xf32, #tpu.memory_space<vmem>>, %arg3: memref<9x8x4xbf16, #tpu.memory_space<vmem>>, %arg4: memref<1x8x256xbf16, #tpu.memory_space<vmem>>, %arg5: memref<1x8x2xf32, #tpu.memory_space<vmem>>) attributes {dimension_semantics = [#tpu.dimension_semantics<parallel>], iteration_bounds = array<i64: 2>, scalar_prefetch = 0 : i64, scratch_operands = 0 : i64, tpu.core_type = #tpu.core_type<tc>, window_params = [{transform_indices = @transform_0, window_bounds = array<i64: 1, 4, 256>}, {pipeline_mode = #tpu.pipeline_mode<synchronous>, transform_indices = @transform_1, window_bounds = array<i64: 9, 256>}, {pipeline_mode = #tpu.pipeline_mode<synchronous>, transform_indices = @transform_2, window_bounds = array<i64: 9, 8, 4>}, {transform_indices = @transform_3, window_bounds = array<i64: 1, 8, 256>}, {transform_indices = @transform_4, window_bounds = array<i64: 1, 8, 2>}]} {
    %c0 = arith.constant 0 : index
    %c0_0 = arith.constant 0 : index
    %c0_1 = arith.constant 0 : index
    %0 = vector.load %arg1[%c0, %c0_0, %c0_1] : memref<1x4x256xf32, #tpu.memory_space<vmem>>, vector<1x4x256xf32>
    %1 = vector.shape_cast %0 : vector<1x4x256xf32> to vector<4x256xf32>
    %cst = arith.constant 0.000000e+00 : f32
    %2 = vector.broadcast %cst : f32 to vector<8x256xf32>
    %c17_i32 = arith.constant 17 : i32
    %3 = tpu.dynamic_rotate %1 by %c17_i32 dim 1 : vector<4x256xf32>, i32 -> vector<4x256xf32>
    %c0_2 = arith.constant 0 : index
    %c0_3 = arith.constant 0 : index
    %4 = vector.load %arg2[%c0_2, %c0_3] : memref<9x256xf32, #tpu.memory_space<vmem>>, vector<1x256xf32>
    %5 = vector.broadcast %4 : vector<1x256xf32> to vector<4x256xf32>
    %6 = arith.mulf %3, %5 : vector<4x256xf32>
    %c0_4 = arith.constant 0 : index
    %c0_5 = arith.constant 0 : index
    %c0_6 = arith.constant 0 : index
    %7 = vector.load %arg3[%c0_4, %c0_5, %c0_6] : memref<9x8x4xbf16, #tpu.memory_space<vmem>>, vector<1x8x4xbf16>
    %8 = vector.shape_cast %7 : vector<1x8x4xbf16> to vector<8x4xbf16>
    %9 = arith.truncf %6 : vector<4x256xf32> to vector<4x256xbf16>
    %cst_7 = arith.constant dense<0.000000e+00> : vector<8x256xf32>
    %10 = tpu.matmul %8, %9, %cst_7 {dimension_numbers = #tpu.dot_dimension_numbers<[1], [0], [0], [1], [0, 0, 1, 1], [], []>} : vector<8x4xbf16>, vector<4x256xbf16>, vector<8x256xf32> -> vector<8x256xf32>
    %11 = arith.addf %2, %10 : vector<8x256xf32>
    %c16_i32 = arith.constant 16 : i32
    %12 = tpu.dynamic_rotate %1 by %c16_i32 dim 1 : vector<4x256xf32>, i32 -> vector<4x256xf32>
    %c1 = arith.constant 1 : index
    %c0_8 = arith.constant 0 : index
    %13 = vector.load %arg2[%c1, %c0_8] : memref<9x256xf32, #tpu.memory_space<vmem>>, vector<1x256xf32>
    %14 = vector.broadcast %13 : vector<1x256xf32> to vector<4x256xf32>
    %15 = arith.mulf %12, %14 : vector<4x256xf32>
    %c1_9 = arith.constant 1 : index
    %c0_10 = arith.constant 0 : index
    %c0_11 = arith.constant 0 : index
    %16 = vector.load %arg3[%c1_9, %c0_10, %c0_11] : memref<9x8x4xbf16, #tpu.memory_space<vmem>>, vector<1x8x4xbf16>
    %17 = vector.shape_cast %16 : vector<1x8x4xbf16> to vector<8x4xbf16>
    %18 = arith.truncf %15 : vector<4x256xf32> to vector<4x256xbf16>
    %cst_12 = arith.constant dense<0.000000e+00> : vector<8x256xf32>
    %19 = tpu.matmul %17, %18, %cst_12 {dimension_numbers = #tpu.dot_dimension_numbers<[1], [0], [0], [1], [0, 0, 1, 1], [], []>} : vector<8x4xbf16>, vector<4x256xbf16>, vector<8x256xf32> -> vector<8x256xf32>
    %20 = arith.addf %11, %19 : vector<8x256xf32>
    %c15_i32 = arith.constant 15 : i32
    %21 = tpu.dynamic_rotate %1 by %c15_i32 dim 1 : vector<4x256xf32>, i32 -> vector<4x256xf32>
    %c2 = arith.constant 2 : index
    %c0_13 = arith.constant 0 : index
    %22 = vector.load %arg2[%c2, %c0_13] : memref<9x256xf32, #tpu.memory_space<vmem>>, vector<1x256xf32>
    %23 = vector.broadcast %22 : vector<1x256xf32> to vector<4x256xf32>
    %24 = arith.mulf %21, %23 : vector<4x256xf32>
    %c2_14 = arith.constant 2 : index
    %c0_15 = arith.constant 0 : index
    %c0_16 = arith.constant 0 : index
    %25 = vector.load %arg3[%c2_14, %c0_15, %c0_16] : memref<9x8x4xbf16, #tpu.memory_space<vmem>>, vector<1x8x4xbf16>
    %26 = vector.shape_cast %25 : vector<1x8x4xbf16> to vector<8x4xbf16>
    %27 = arith.truncf %24 : vector<4x256xf32> to vector<4x256xbf16>
    %cst_17 = arith.constant dense<0.000000e+00> : vector<8x256xf32>
    %28 = tpu.matmul %26, %27, %cst_17 {dimension_numbers = #tpu.dot_dimension_numbers<[1], [0], [0], [1], [0, 0, 1, 1], [], []>} : vector<8x4xbf16>, vector<4x256xbf16>, vector<8x256xf32> -> vector<8x256xf32>
    %29 = arith.addf %20, %28 : vector<8x256xf32>
    %c1_i32 = arith.constant 1 : i32
    %30 = tpu.dynamic_rotate %1 by %c1_i32 dim 1 : vector<4x256xf32>, i32 -> vector<4x256xf32>
    %c3 = arith.constant 3 : index
    %c0_18 = arith.constant 0 : index
    %31 = vector.load %arg2[%c3, %c0_18] : memref<9x256xf32, #tpu.memory_space<vmem>>, vector<1x256xf32>
    %32 = vector.broadcast %31 : vector<1x256xf32> to vector<4x256xf32>
    %33 = arith.mulf %30, %32 : vector<4x256xf32>
    %c3_19 = arith.constant 3 : index
    %c0_20 = arith.constant 0 : index
    %c0_21 = arith.constant 0 : index
    %34 = vector.load %arg3[%c3_19, %c0_20, %c0_21] : memref<9x8x4xbf16, #tpu.memory_space<vmem>>, vector<1x8x4xbf16>
    %35 = vector.shape_cast %34 : vector<1x8x4xbf16> to vector<8x4xbf16>
    %36 = arith.truncf %33 : vector<4x256xf32> to vector<4x256xbf16>
    %cst_22 = arith.constant dense<0.000000e+00> : vector<8x256xf32>
    %37 = tpu.matmul %35, %36, %cst_22 {dimension_numbers = #tpu.dot_dimension_numbers<[1], [0], [0], [1], [0, 0, 1, 1], [], []>} : vector<8x4xbf16>, vector<4x256xbf16>, vector<8x256xf32> -> vector<8x256xf32>
    %38 = arith.addf %29, %37 : vector<8x256xf32>
    %c4 = arith.constant 4 : index
    %c0_23 = arith.constant 0 : index
    %c0_24 = arith.constant 0 : index
    %39 = vector.load %arg3[%c4, %c0_23, %c0_24] : memref<9x8x4xbf16, #tpu.memory_space<vmem>>, vector<1x8x4xbf16>
    %40 = vector.shape_cast %39 : vector<1x8x4xbf16> to vector<8x4xbf16>
    %41 = arith.truncf %1 : vector<4x256xf32> to vector<4x256xbf16>
    %cst_25 = arith.constant dense<0.000000e+00> : vector<8x256xf32>
    %42 = tpu.matmul %40, %41, %cst_25 {dimension_numbers = #tpu.dot_dimension_numbers<[1], [0], [0], [1], [0, 0, 1, 1], [], []>} : vector<8x4xbf16>, vector<4x256xbf16>, vector<8x256xf32> -> vector<8x256xf32>
    %43 = arith.addf %38, %42 : vector<8x256xf32>
    %c255_i32 = arith.constant 255 : i32
    %44 = tpu.dynamic_rotate %1 by %c255_i32 dim 1 : vector<4x256xf32>, i32 -> vector<4x256xf32>
    %c5 = arith.constant 5 : index
    %c0_26 = arith.constant 0 : index
    %45 = vector.load %arg2[%c5, %c0_26] : memref<9x256xf32, #tpu.memory_space<vmem>>, vector<1x256xf32>
    %46 = vector.broadcast %45 : vector<1x256xf32> to vector<4x256xf32>
    %47 = arith.mulf %44, %46 : vector<4x256xf32>
    %c5_27 = arith.constant 5 : index
    %c0_28 = arith.constant 0 : index
    %c0_29 = arith.constant 0 : index
    %48 = vector.load %arg3[%c5_27, %c0_28, %c0_29] : memref<9x8x4xbf16, #tpu.memory_space<vmem>>, vector<1x8x4xbf16>
    %49 = vector.shape_cast %48 : vector<1x8x4xbf16> to vector<8x4xbf16>
    %50 = arith.truncf %47 : vector<4x256xf32> to vector<4x256xbf16>
    %cst_30 = arith.constant dense<0.000000e+00> : vector<8x256xf32>
    %51 = tpu.matmul %49, %50, %cst_30 {dimension_numbers = #tpu.dot_dimension_numbers<[1], [0], [0], [1], [0, 0, 1, 1], [], []>} : vector<8x4xbf16>, vector<4x256xbf16>, vector<8x256xf32> -> vector<8x256xf32>
    %52 = arith.addf %43, %51 : vector<8x256xf32>
    %c241_i32 = arith.constant 241 : i32
    %53 = tpu.dynamic_rotate %1 by %c241_i32 dim 1 : vector<4x256xf32>, i32 -> vector<4x256xf32>
    %c6 = arith.constant 6 : index
    %c0_31 = arith.constant 0 : index
    %54 = vector.load %arg2[%c6, %c0_31] : memref<9x256xf32, #tpu.memory_space<vmem>>, vector<1x256xf32>
    %55 = vector.broadcast %54 : vector<1x256xf32> to vector<4x256xf32>
    %56 = arith.mulf %53, %55 : vector<4x256xf32>
    %c6_32 = arith.constant 6 : index
    %c0_33 = arith.constant 0 : index
    %c0_34 = arith.constant 0 : index
    %57 = vector.load %arg3[%c6_32, %c0_33, %c0_34] : memref<9x8x4xbf16, #tpu.memory_space<vmem>>, vector<1x8x4xbf16>
    %58 = vector.shape_cast %57 : vector<1x8x4xbf16> to vector<8x4xbf16>
    %59 = arith.truncf %56 : vector<4x256xf32> to vector<4x256xbf16>
    %cst_35 = arith.constant dense<0.000000e+00> : vector<8x256xf32>
    %60 = tpu.matmul %58, %59, %cst_35 {dimension_numbers = #tpu.dot_dimension_numbers<[1], [0], [0], [1], [0, 0, 1, 1], [], []>} : vector<8x4xbf16>, vector<4x256xbf16>, vector<8x256xf32> -> vector<8x256xf32>
    %61 = arith.addf %52, %60 : vector<8x256xf32>
    %c240_i32 = arith.constant 240 : i32
    %62 = tpu.dynamic_rotate %1 by %c240_i32 dim 1 : vector<4x256xf32>, i32 -> vector<4x256xf32>
    %c7 = arith.constant 7 : index
    %c0_36 = arith.constant 0 : index
    %63 = vector.load %arg2[%c7, %c0_36] : memref<9x256xf32, #tpu.memory_space<vmem>>, vector<1x256xf32>
    %64 = vector.broadcast %63 : vector<1x256xf32> to vector<4x256xf32>
    %65 = arith.mulf %62, %64 : vector<4x256xf32>
    %c7_37 = arith.constant 7 : index
    %c0_38 = arith.constant 0 : index
    %c0_39 = arith.constant 0 : index
    %66 = vector.load %arg3[%c7_37, %c0_38, %c0_39] : memref<9x8x4xbf16, #tpu.memory_space<vmem>>, vector<1x8x4xbf16>
    %67 = vector.shape_cast %66 : vector<1x8x4xbf16> to vector<8x4xbf16>
    %68 = arith.truncf %65 : vector<4x256xf32> to vector<4x256xbf16>
    %cst_40 = arith.constant dense<0.000000e+00> : vector<8x256xf32>
    %69 = tpu.matmul %67, %68, %cst_40 {dimension_numbers = #tpu.dot_dimension_numbers<[1], [0], [0], [1], [0, 0, 1, 1], [], []>} : vector<8x4xbf16>, vector<4x256xbf16>, vector<8x256xf32> -> vector<8x256xf32>
    %70 = arith.addf %61, %69 : vector<8x256xf32>
    %c239_i32 = arith.constant 239 : i32
    %71 = tpu.dynamic_rotate %1 by %c239_i32 dim 1 : vector<4x256xf32>, i32 -> vector<4x256xf32>
    %c8 = arith.constant 8 : index
    %c0_41 = arith.constant 0 : index
    %72 = vector.load %arg2[%c8, %c0_41] : memref<9x256xf32, #tpu.memory_space<vmem>>, vector<1x256xf32>
    %73 = vector.broadcast %72 : vector<1x256xf32> to vector<4x256xf32>
    %74 = arith.mulf %71, %73 : vector<4x256xf32>
    %c8_42 = arith.constant 8 : index
    %c0_43 = arith.constant 0 : index
    %c0_44 = arith.constant 0 : index
    %75 = vector.load %arg3[%c8_42, %c0_43, %c0_44] : memref<9x8x4xbf16, #tpu.memory_space<vmem>>, vector<1x8x4xbf16>
    %76 = vector.shape_cast %75 : vector<1x8x4xbf16> to vector<8x4xbf16>
    %77 = arith.truncf %74 : vector<4x256xf32> to vector<4x256xbf16>
    %cst_45 = arith.constant dense<0.000000e+00> : vector<8x256xf32>
    %78 = tpu.matmul %76, %77, %cst_45 {dimension_numbers = #tpu.dot_dimension_numbers<[1], [0], [0], [1], [0, 0, 1, 1], [], []>} : vector<8x4xbf16>, vector<4x256xbf16>, vector<8x256xf32> -> vector<8x256xf32>
    %79 = arith.addf %70, %78 : vector<8x256xf32>
    %cst_46 = arith.constant dense<0.000000e+00> : vector<8xf32>
    %80 = vector.multi_reduction <add>, %79, %cst_46 [1] : vector<8x256xf32> to vector<8xf32>
    %81 = vector.shape_cast %80 : vector<8xf32> to vector<8x1xf32>
    %82 = arith.mulf %79, %79 : vector<8x256xf32>
    %cst_47 = arith.constant dense<0.000000e+00> : vector<8xf32>
    %83 = vector.multi_reduction <add>, %82, %cst_47 [1] : vector<8x256xf32> to vector<8xf32>
    %84 = vector.shape_cast %83 : vector<8xf32> to vector<8x1xf32>
    %85 = tpu.concatenate %81, %84 in 1 : vector<8x1xf32>, vector<8x1xf32> -> vector<8x2xf32>
    %86 = vector.shape_cast %85 : vector<8x2xf32> to vector<1x8x2xf32>
    %c0_48 = arith.constant 0 : index
    %c0_49 = arith.constant 0 : index
    %c0_50 = arith.constant 0 : index
    %87 = vector.load %arg5[%c0_48, %c0_49, %c0_50] : memref<1x8x2xf32, #tpu.memory_space<vmem>>, vector<1x8x2xf32>
    tpu.vector_store %arg5[%c0_48, %c0_49, %c0_50], %86 {strides = array<i32>} : memref<1x8x2xf32, #tpu.memory_space<vmem>>, vector<1x8x2xf32>,
    %88 = arith.truncf %79 : vector<8x256xf32> to vector<8x256xbf16>
    %89 = vector.shape_cast %88 : vector<8x256xbf16> to vector<1x8x256xbf16>
    %c0_51 = arith.constant 0 : index
    %c0_52 = arith.constant 0 : index
    %c0_53 = arith.constant 0 : index
    %90 = vector.load %arg4[%c0_51, %c0_52, %c0_53] : memref<1x8x256xbf16, #tpu.memory_space<vmem>>, vector<1x8x256xbf16>
    tpu.vector_store %arg4[%c0_51, %c0_52, %c0_53], %89 {strides = array<i32>} : memref<1x8x256xbf16, #tpu.memory_space<vmem>>, vector<1x8x256xbf16>,
    return
  }
  func.func @transform_0(%arg0: i32) -> (i32, i32, i32) {
    %c0_i32 = arith.constant 0 : i32
    %c0_i32_0 = arith.constant 0 : i32
    %c0_i32_1 = arith.constant 0 : i32
    return %arg0, %c0_i32, %c0_i32_0 : i32, i32, i32
  }
  func.func @transform_1(%arg0: i32) -> (i32, i32) {
    %c0_i32 = arith.constant 0 : i32
    %c0_i32_0 = arith.constant 0 : i32
    %c0_i32_1 = arith.constant 0 : i32
    return %c0_i32, %c0_i32_0 : i32, i32
  }
  func.func @transform_2(%arg0: i32) -> (i32, i32, i32) {
    %c0_i32 = arith.constant 0 : i32
    %c0_i32_0 = arith.constant 0 : i32
    %c0_i32_1 = arith.constant 0 : i32
    %c0_i32_2 = arith.constant 0 : i32
    return %c0_i32, %c0_i32_0, %c0_i32_1 : i32, i32, i32
  }
  func.func @transform_3(%arg0: i32) -> (i32, i32, i32) {
    %c0_i32 = arith.constant 0 : i32
    %c0_i32_0 = arith.constant 0 : i32
    %c0_i32_1 = arith.constant 0 : i32
    return %arg0, %c0_i32, %c0_i32_0 : i32, i32, i32
  }
  func.func @transform_4(%arg0: i32) -> (i32, i32, i32) {
    %c0_i32 = arith.constant 0 : i32
    %c0_i32_0 = arith.constant 0 : i32
    %c0_i32_1 = arith.constant 0 : i32
    return %arg0, %c0_i32, %c0_i32_0 : i32, i32, i32
  }
}

module attributes {stable_mosaic.version = 11 : i64} {
  func.func @_bn_relu_conv_kernel(%arg0: i32, %arg1: memref<1x8x256xbf16, #tpu.memory_space<vmem>>, %arg2: memref<8x1xf32, #tpu.memory_space<vmem>>, %arg3: memref<8x1xf32, #tpu.memory_space<vmem>>, %arg4: memref<9x256xf32, #tpu.memory_space<vmem>>, %arg5: memref<9x8x8xbf16, #tpu.memory_space<vmem>>, %arg6: memref<1x8x256xbf16, #tpu.memory_space<vmem>>, %arg7: memref<1x8x2xf32, #tpu.memory_space<vmem>>) attributes {dimension_semantics = [#tpu.dimension_semantics<parallel>], iteration_bounds = array<i64: 2>, scalar_prefetch = 0 : i64, scratch_operands = 0 : i64, tpu.core_type = #tpu.core_type<tc>, window_params = [{transform_indices = @transform_0, window_bounds = array<i64: 1, 8, 256>}, {pipeline_mode = #tpu.pipeline_mode<synchronous>, transform_indices = @transform_1, window_bounds = array<i64: 8, 1>}, {pipeline_mode = #tpu.pipeline_mode<synchronous>, transform_indices = @transform_2, window_bounds = array<i64: 8, 1>}, {pipeline_mode = #tpu.pipeline_mode<synchronous>, transform_indices = @transform_3, window_bounds = array<i64: 9, 256>}, {pipeline_mode = #tpu.pipeline_mode<synchronous>, transform_indices = @transform_4, window_bounds = array<i64: 9, 8, 8>}, {transform_indices = @transform_5, window_bounds = array<i64: 1, 8, 256>}, {transform_indices = @transform_6, window_bounds = array<i64: 1, 8, 2>}]} {
    %c0 = arith.constant 0 : index
    %c0_0 = arith.constant 0 : index
    %c0_1 = arith.constant 0 : index
    %0 = vector.load %arg1[%c0, %c0_0, %c0_1] : memref<1x8x256xbf16, #tpu.memory_space<vmem>>, vector<1x8x256xbf16>
    %1 = vector.shape_cast %0 : vector<1x8x256xbf16> to vector<8x256xbf16>
    %2 = arith.extf %1 : vector<8x256xbf16> to vector<8x256xf32>
    %c0_2 = arith.constant 0 : index
    %c0_3 = arith.constant 0 : index
    %3 = vector.load %arg2[%c0_2, %c0_3] : memref<8x1xf32, #tpu.memory_space<vmem>>, vector<8x1xf32>
    %4 = vector.broadcast %3 : vector<8x1xf32> to vector<8x256xf32>
    %5 = arith.mulf %2, %4 : vector<8x256xf32>
    %c0_4 = arith.constant 0 : index
    %c0_5 = arith.constant 0 : index
    %6 = vector.load %arg3[%c0_4, %c0_5] : memref<8x1xf32, #tpu.memory_space<vmem>>, vector<8x1xf32>
    %7 = vector.broadcast %6 : vector<8x1xf32> to vector<8x256xf32>
    %8 = arith.addf %5, %7 : vector<8x256xf32>
    %cst = arith.constant 0.000000e+00 : f32
    %9 = vector.broadcast %cst : f32 to vector<8x256xf32>
    %10 = arith.maximumf %8, %9 : vector<8x256xf32>
    %cst_6 = arith.constant 0.000000e+00 : f32
    %11 = vector.broadcast %cst_6 : f32 to vector<8x256xf32>
    %c17_i32 = arith.constant 17 : i32
    %12 = tpu.dynamic_rotate %10 by %c17_i32 dim 1 : vector<8x256xf32>, i32 -> vector<8x256xf32>
    %c0_7 = arith.constant 0 : index
    %c0_8 = arith.constant 0 : index
    %13 = vector.load %arg4[%c0_7, %c0_8] : memref<9x256xf32, #tpu.memory_space<vmem>>, vector<1x256xf32>
    %14 = vector.broadcast %13 : vector<1x256xf32> to vector<8x256xf32>
    %15 = arith.mulf %12, %14 : vector<8x256xf32>
    %c0_9 = arith.constant 0 : index
    %c0_10 = arith.constant 0 : index
    %c0_11 = arith.constant 0 : index
    %16 = vector.load %arg5[%c0_9, %c0_10, %c0_11] : memref<9x8x8xbf16, #tpu.memory_space<vmem>>, vector<1x8x8xbf16>
    %17 = vector.shape_cast %16 : vector<1x8x8xbf16> to vector<8x8xbf16>
    %18 = arith.truncf %15 : vector<8x256xf32> to vector<8x256xbf16>
    %cst_12 = arith.constant dense<0.000000e+00> : vector<8x256xf32>
    %19 = tpu.matmul %17, %18, %cst_12 {dimension_numbers = #tpu.dot_dimension_numbers<[1], [0], [0], [1], [0, 0, 1, 1], [], []>} : vector<8x8xbf16>, vector<8x256xbf16>, vector<8x256xf32> -> vector<8x256xf32>
    %20 = arith.addf %11, %19 : vector<8x256xf32>
    %c16_i32 = arith.constant 16 : i32
    %21 = tpu.dynamic_rotate %10 by %c16_i32 dim 1 : vector<8x256xf32>, i32 -> vector<8x256xf32>
    %c1 = arith.constant 1 : index
    %c0_13 = arith.constant 0 : index
    %22 = vector.load %arg4[%c1, %c0_13] : memref<9x256xf32, #tpu.memory_space<vmem>>, vector<1x256xf32>
    %23 = vector.broadcast %22 : vector<1x256xf32> to vector<8x256xf32>
    %24 = arith.mulf %21, %23 : vector<8x256xf32>
    %c1_14 = arith.constant 1 : index
    %c0_15 = arith.constant 0 : index
    %c0_16 = arith.constant 0 : index
    %25 = vector.load %arg5[%c1_14, %c0_15, %c0_16] : memref<9x8x8xbf16, #tpu.memory_space<vmem>>, vector<1x8x8xbf16>
    %26 = vector.shape_cast %25 : vector<1x8x8xbf16> to vector<8x8xbf16>
    %27 = arith.truncf %24 : vector<8x256xf32> to vector<8x256xbf16>
    %cst_17 = arith.constant dense<0.000000e+00> : vector<8x256xf32>
    %28 = tpu.matmul %26, %27, %cst_17 {dimension_numbers = #tpu.dot_dimension_numbers<[1], [0], [0], [1], [0, 0, 1, 1], [], []>} : vector<8x8xbf16>, vector<8x256xbf16>, vector<8x256xf32> -> vector<8x256xf32>
    %29 = arith.addf %20, %28 : vector<8x256xf32>
    %c15_i32 = arith.constant 15 : i32
    %30 = tpu.dynamic_rotate %10 by %c15_i32 dim 1 : vector<8x256xf32>, i32 -> vector<8x256xf32>
    %c2 = arith.constant 2 : index
    %c0_18 = arith.constant 0 : index
    %31 = vector.load %arg4[%c2, %c0_18] : memref<9x256xf32, #tpu.memory_space<vmem>>, vector<1x256xf32>
    %32 = vector.broadcast %31 : vector<1x256xf32> to vector<8x256xf32>
    %33 = arith.mulf %30, %32 : vector<8x256xf32>
    %c2_19 = arith.constant 2 : index
    %c0_20 = arith.constant 0 : index
    %c0_21 = arith.constant 0 : index
    %34 = vector.load %arg5[%c2_19, %c0_20, %c0_21] : memref<9x8x8xbf16, #tpu.memory_space<vmem>>, vector<1x8x8xbf16>
    %35 = vector.shape_cast %34 : vector<1x8x8xbf16> to vector<8x8xbf16>
    %36 = arith.truncf %33 : vector<8x256xf32> to vector<8x256xbf16>
    %cst_22 = arith.constant dense<0.000000e+00> : vector<8x256xf32>
    %37 = tpu.matmul %35, %36, %cst_22 {dimension_numbers = #tpu.dot_dimension_numbers<[1], [0], [0], [1], [0, 0, 1, 1], [], []>} : vector<8x8xbf16>, vector<8x256xbf16>, vector<8x256xf32> -> vector<8x256xf32>
    %38 = arith.addf %29, %37 : vector<8x256xf32>
    %c1_i32 = arith.constant 1 : i32
    %39 = tpu.dynamic_rotate %10 by %c1_i32 dim 1 : vector<8x256xf32>, i32 -> vector<8x256xf32>
    %c3 = arith.constant 3 : index
    %c0_23 = arith.constant 0 : index
    %40 = vector.load %arg4[%c3, %c0_23] : memref<9x256xf32, #tpu.memory_space<vmem>>, vector<1x256xf32>
    %41 = vector.broadcast %40 : vector<1x256xf32> to vector<8x256xf32>
    %42 = arith.mulf %39, %41 : vector<8x256xf32>
    %c3_24 = arith.constant 3 : index
    %c0_25 = arith.constant 0 : index
    %c0_26 = arith.constant 0 : index
    %43 = vector.load %arg5[%c3_24, %c0_25, %c0_26] : memref<9x8x8xbf16, #tpu.memory_space<vmem>>, vector<1x8x8xbf16>
    %44 = vector.shape_cast %43 : vector<1x8x8xbf16> to vector<8x8xbf16>
    %45 = arith.truncf %42 : vector<8x256xf32> to vector<8x256xbf16>
    %cst_27 = arith.constant dense<0.000000e+00> : vector<8x256xf32>
    %46 = tpu.matmul %44, %45, %cst_27 {dimension_numbers = #tpu.dot_dimension_numbers<[1], [0], [0], [1], [0, 0, 1, 1], [], []>} : vector<8x8xbf16>, vector<8x256xbf16>, vector<8x256xf32> -> vector<8x256xf32>
    %47 = arith.addf %38, %46 : vector<8x256xf32>
    %c4 = arith.constant 4 : index
    %c0_28 = arith.constant 0 : index
    %c0_29 = arith.constant 0 : index
    %48 = vector.load %arg5[%c4, %c0_28, %c0_29] : memref<9x8x8xbf16, #tpu.memory_space<vmem>>, vector<1x8x8xbf16>
    %49 = vector.shape_cast %48 : vector<1x8x8xbf16> to vector<8x8xbf16>
    %50 = arith.truncf %10 : vector<8x256xf32> to vector<8x256xbf16>
    %cst_30 = arith.constant dense<0.000000e+00> : vector<8x256xf32>
    %51 = tpu.matmul %49, %50, %cst_30 {dimension_numbers = #tpu.dot_dimension_numbers<[1], [0], [0], [1], [0, 0, 1, 1], [], []>} : vector<8x8xbf16>, vector<8x256xbf16>, vector<8x256xf32> -> vector<8x256xf32>
    %52 = arith.addf %47, %51 : vector<8x256xf32>
    %c255_i32 = arith.constant 255 : i32
    %53 = tpu.dynamic_rotate %10 by %c255_i32 dim 1 : vector<8x256xf32>, i32 -> vector<8x256xf32>
    %c5 = arith.constant 5 : index
    %c0_31 = arith.constant 0 : index
    %54 = vector.load %arg4[%c5, %c0_31] : memref<9x256xf32, #tpu.memory_space<vmem>>, vector<1x256xf32>
    %55 = vector.broadcast %54 : vector<1x256xf32> to vector<8x256xf32>
    %56 = arith.mulf %53, %55 : vector<8x256xf32>
    %c5_32 = arith.constant 5 : index
    %c0_33 = arith.constant 0 : index
    %c0_34 = arith.constant 0 : index
    %57 = vector.load %arg5[%c5_32, %c0_33, %c0_34] : memref<9x8x8xbf16, #tpu.memory_space<vmem>>, vector<1x8x8xbf16>
    %58 = vector.shape_cast %57 : vector<1x8x8xbf16> to vector<8x8xbf16>
    %59 = arith.truncf %56 : vector<8x256xf32> to vector<8x256xbf16>
    %cst_35 = arith.constant dense<0.000000e+00> : vector<8x256xf32>
    %60 = tpu.matmul %58, %59, %cst_35 {dimension_numbers = #tpu.dot_dimension_numbers<[1], [0], [0], [1], [0, 0, 1, 1], [], []>} : vector<8x8xbf16>, vector<8x256xbf16>, vector<8x256xf32> -> vector<8x256xf32>
    %61 = arith.addf %52, %60 : vector<8x256xf32>
    %c241_i32 = arith.constant 241 : i32
    %62 = tpu.dynamic_rotate %10 by %c241_i32 dim 1 : vector<8x256xf32>, i32 -> vector<8x256xf32>
    %c6 = arith.constant 6 : index
    %c0_36 = arith.constant 0 : index
    %63 = vector.load %arg4[%c6, %c0_36] : memref<9x256xf32, #tpu.memory_space<vmem>>, vector<1x256xf32>
    %64 = vector.broadcast %63 : vector<1x256xf32> to vector<8x256xf32>
    %65 = arith.mulf %62, %64 : vector<8x256xf32>
    %c6_37 = arith.constant 6 : index
    %c0_38 = arith.constant 0 : index
    %c0_39 = arith.constant 0 : index
    %66 = vector.load %arg5[%c6_37, %c0_38, %c0_39] : memref<9x8x8xbf16, #tpu.memory_space<vmem>>, vector<1x8x8xbf16>
    %67 = vector.shape_cast %66 : vector<1x8x8xbf16> to vector<8x8xbf16>
    %68 = arith.truncf %65 : vector<8x256xf32> to vector<8x256xbf16>
    %cst_40 = arith.constant dense<0.000000e+00> : vector<8x256xf32>
    %69 = tpu.matmul %67, %68, %cst_40 {dimension_numbers = #tpu.dot_dimension_numbers<[1], [0], [0], [1], [0, 0, 1, 1], [], []>} : vector<8x8xbf16>, vector<8x256xbf16>, vector<8x256xf32> -> vector<8x256xf32>
    %70 = arith.addf %61, %69 : vector<8x256xf32>
    %c240_i32 = arith.constant 240 : i32
    %71 = tpu.dynamic_rotate %10 by %c240_i32 dim 1 : vector<8x256xf32>, i32 -> vector<8x256xf32>
    %c7 = arith.constant 7 : index
    %c0_41 = arith.constant 0 : index
    %72 = vector.load %arg4[%c7, %c0_41] : memref<9x256xf32, #tpu.memory_space<vmem>>, vector<1x256xf32>
    %73 = vector.broadcast %72 : vector<1x256xf32> to vector<8x256xf32>
    %74 = arith.mulf %71, %73 : vector<8x256xf32>
    %c7_42 = arith.constant 7 : index
    %c0_43 = arith.constant 0 : index
    %c0_44 = arith.constant 0 : index
    %75 = vector.load %arg5[%c7_42, %c0_43, %c0_44] : memref<9x8x8xbf16, #tpu.memory_space<vmem>>, vector<1x8x8xbf16>
    %76 = vector.shape_cast %75 : vector<1x8x8xbf16> to vector<8x8xbf16>
    %77 = arith.truncf %74 : vector<8x256xf32> to vector<8x256xbf16>
    %cst_45 = arith.constant dense<0.000000e+00> : vector<8x256xf32>
    %78 = tpu.matmul %76, %77, %cst_45 {dimension_numbers = #tpu.dot_dimension_numbers<[1], [0], [0], [1], [0, 0, 1, 1], [], []>} : vector<8x8xbf16>, vector<8x256xbf16>, vector<8x256xf32> -> vector<8x256xf32>
    %79 = arith.addf %70, %78 : vector<8x256xf32>
    %c239_i32 = arith.constant 239 : i32
    %80 = tpu.dynamic_rotate %10 by %c239_i32 dim 1 : vector<8x256xf32>, i32 -> vector<8x256xf32>
    %c8 = arith.constant 8 : index
    %c0_46 = arith.constant 0 : index
    %81 = vector.load %arg4[%c8, %c0_46] : memref<9x256xf32, #tpu.memory_space<vmem>>, vector<1x256xf32>
    %82 = vector.broadcast %81 : vector<1x256xf32> to vector<8x256xf32>
    %83 = arith.mulf %80, %82 : vector<8x256xf32>
    %c8_47 = arith.constant 8 : index
    %c0_48 = arith.constant 0 : index
    %c0_49 = arith.constant 0 : index
    %84 = vector.load %arg5[%c8_47, %c0_48, %c0_49] : memref<9x8x8xbf16, #tpu.memory_space<vmem>>, vector<1x8x8xbf16>
    %85 = vector.shape_cast %84 : vector<1x8x8xbf16> to vector<8x8xbf16>
    %86 = arith.truncf %83 : vector<8x256xf32> to vector<8x256xbf16>
    %cst_50 = arith.constant dense<0.000000e+00> : vector<8x256xf32>
    %87 = tpu.matmul %85, %86, %cst_50 {dimension_numbers = #tpu.dot_dimension_numbers<[1], [0], [0], [1], [0, 0, 1, 1], [], []>} : vector<8x8xbf16>, vector<8x256xbf16>, vector<8x256xf32> -> vector<8x256xf32>
    %88 = arith.addf %79, %87 : vector<8x256xf32>
    %cst_51 = arith.constant dense<0.000000e+00> : vector<8xf32>
    %89 = vector.multi_reduction <add>, %88, %cst_51 [1] : vector<8x256xf32> to vector<8xf32>
    %90 = vector.shape_cast %89 : vector<8xf32> to vector<8x1xf32>
    %91 = arith.mulf %88, %88 : vector<8x256xf32>
    %cst_52 = arith.constant dense<0.000000e+00> : vector<8xf32>
    %92 = vector.multi_reduction <add>, %91, %cst_52 [1] : vector<8x256xf32> to vector<8xf32>
    %93 = vector.shape_cast %92 : vector<8xf32> to vector<8x1xf32>
    %94 = tpu.concatenate %90, %93 in 1 : vector<8x1xf32>, vector<8x1xf32> -> vector<8x2xf32>
    %95 = vector.shape_cast %94 : vector<8x2xf32> to vector<1x8x2xf32>
    %c0_53 = arith.constant 0 : index
    %c0_54 = arith.constant 0 : index
    %c0_55 = arith.constant 0 : index
    %96 = vector.load %arg7[%c0_53, %c0_54, %c0_55] : memref<1x8x2xf32, #tpu.memory_space<vmem>>, vector<1x8x2xf32>
    tpu.vector_store %arg7[%c0_53, %c0_54, %c0_55], %95 {strides = array<i32>} : memref<1x8x2xf32, #tpu.memory_space<vmem>>, vector<1x8x2xf32>,
    %97 = arith.truncf %88 : vector<8x256xf32> to vector<8x256xbf16>
    %98 = vector.shape_cast %97 : vector<8x256xbf16> to vector<1x8x256xbf16>
    %c0_56 = arith.constant 0 : index
    %c0_57 = arith.constant 0 : index
    %c0_58 = arith.constant 0 : index
    %99 = vector.load %arg6[%c0_56, %c0_57, %c0_58] : memref<1x8x256xbf16, #tpu.memory_space<vmem>>, vector<1x8x256xbf16>
    tpu.vector_store %arg6[%c0_56, %c0_57, %c0_58], %98 {strides = array<i32>} : memref<1x8x256xbf16, #tpu.memory_space<vmem>>, vector<1x8x256xbf16>,
    return
  }
  func.func @transform_0(%arg0: i32) -> (i32, i32, i32) {
    %c0_i32 = arith.constant 0 : i32
    %c0_i32_0 = arith.constant 0 : i32
    %c0_i32_1 = arith.constant 0 : i32
    return %arg0, %c0_i32, %c0_i32_0 : i32, i32, i32
  }
  func.func @transform_1(%arg0: i32) -> (i32, i32) {
    %c0_i32 = arith.constant 0 : i32
    %c0_i32_0 = arith.constant 0 : i32
    %c0_i32_1 = arith.constant 0 : i32
    return %c0_i32, %c0_i32_0 : i32, i32
  }
  func.func @transform_2(%arg0: i32) -> (i32, i32) {
    %c0_i32 = arith.constant 0 : i32
    %c0_i32_0 = arith.constant 0 : i32
    %c0_i32_1 = arith.constant 0 : i32
    return %c0_i32, %c0_i32_0 : i32, i32
  }
  func.func @transform_3(%arg0: i32) -> (i32, i32) {
    %c0_i32 = arith.constant 0 : i32
    %c0_i32_0 = arith.constant 0 : i32
    %c0_i32_1 = arith.constant 0 : i32
    return %c0_i32, %c0_i32_0 : i32, i32
  }
  func.func @transform_4(%arg0: i32) -> (i32, i32, i32) {
    %c0_i32 = arith.constant 0 : i32
    %c0_i32_0 = arith.constant 0 : i32
    %c0_i32_1 = arith.constant 0 : i32
    %c0_i32_2 = arith.constant 0 : i32
    return %c0_i32, %c0_i32_0, %c0_i32_1 : i32, i32, i32
  }
  func.func @transform_5(%arg0: i32) -> (i32, i32, i32) {
    %c0_i32 = arith.constant 0 : i32
    %c0_i32_0 = arith.constant 0 : i32
    %c0_i32_1 = arith.constant 0 : i32
    return %arg0, %c0_i32, %c0_i32_0 : i32, i32, i32
  }
  func.func @transform_6(%arg0: i32) -> (i32, i32, i32) {
    %c0_i32 = arith.constant 0 : i32
    %c0_i32_0 = arith.constant 0 : i32
    %c0_i32_1 = arith.constant 0 : i32
    return %arg0, %c0_i32, %c0_i32_0 : i32, i32, i32
  }
}

</mosaic_0001>

<bundles_post_ra>
// kernel: conv_block_forward.2
= control target key start
LH: loop header
LB: loop body
LE: loop exit
PB: predicated region body
PF: predicated region fallthrough
CT: control target
= control target key end

     0   :  { %s1138_s15 = smov 0   ;;  %s1296_s0 = inlined_call_operand.vmem [shape: f32[2,4,256], index: 0, kind: input, shape index: {}]   ;;  %s1297_s1 = inlined_call_operand.vmem [shape: f32[9,256], index: 1, kind: input, shape index: {}]   ;;  %s1298_s2 = inlined_call_operand.vmem [shape: bf16[9,8,4], index: 2, kind: input, shape index: {}]   ;;  %s1299_s3 = inlined_call_operand.vmem [shape: bf16[2,8,256], index: 3, kind: output, shape index: {0}]   ;;  %s1300_s4 = inlined_call_operand.vmem [shape: f32[2,8,2], index: 4, kind: output, shape index: {1}]  }
   0x1 LB: > { %s999_s16 = sadd.s32 4294967295, %s1102_s15   ;;  %p1003_p0 = scmp.ge.s32.totalorder %s1102_s15, 1  ;;  %s1102_s15 = sphi %s1138_s15, %s15_s15  }
   0x2   : > { %p165_p1 = scmp.lt.s32.totalorder %s1102_s15, 3 }
   0x4   : > { %p166_p2 = pnand %p1003_p0, %p165_p1 }
   0x5   : > { %p195_p3 = scmp.lt.s32.totalorder (!%p166_p2), %s999_s16, 1  ;;  %v1104_v0 = vmov (!%p166_p2), 0   ;;  %s1105_s21 = smov (!%p166_p2), 127   ;;  %vm270_vm0 = vcmask (!%p166_p2), 1041408   ;;  %vm266_vm1 = vcmask (!%p166_p2), 31744   ;;  %v218_v7 = vlaneseq (!%p166_p2) }
   0x6   : > { %169 = sbr.rel (%p166_p2) target bundleno = 544 (0x220), region = 32  ;;  %569 = vmatprep.mubr.bf16.mxu0 (!%p166_p2), %v1104_v0  ;;  %309 = vmatprep.mubr.bf16.mxu1 (!%p166_p2), %v1104_v0  ;;  %s1106_s22 = smov (!%p166_p2), 16   ;;  %v1023_v6 = vld [vmem:[%s1298_s2 + $0x10] sm:$0xf] (!%p166_p2)  ;;  %v1010_v49 = vld [vmem:[%s1298_s2 + $0x4] sm:$0xf] (!%p166_p2) }
   0x7   : > { %s1107_s25 = smov (!%p166_p2), 17   ;;  %s1108_s26 = smov (!%p166_p2), 113   ;;  %v226_v8 = vshrl.u32 (!%p166_p2), %v218_v7, 7  ;;  %v1161_v9 = vand.u32 (!%p166_p2), 127, %v218_v7  ;;  %v1027_v50 = vld [vmem:[%s1298_s2 + $0x14] sm:$0xf] (!%p166_p2) }
   0x8   : > { %s1109_s27 = smov (!%p166_p2), 15   ;;  %s1110_s28 = smov (!%p166_p2), 112   ;;  %v1026_v12 = vld [vmem:[%s1297_s1 + $0x5] ss:$8 sm:$0x3] (!%p166_p2)  ;;  %vm900_vm10 = vcmask (!%p166_p2), 7168  }
   0x9   : > { %s1111_s29 = smov (!%p166_p2), 1   ;;  %s1112_s30 = smov (!%p166_p2), 111   ;;  %v1163_v10 = vsub.s32 (!%p166_p2), 0, %v226_v8  ;;  %v1165_v11 = vsub.s32 (!%p166_p2), 1, %v226_v8  ;;  %vm584_vm2 = vcmp.lt.s32.totalorder (!%p166_p2), %v1161_v9, 127  ;;  %vm244_vm3 = vcmp.lt.s32.totalorder (!%p166_p2), %v1161_v9, 16 }
   0xa   : > { %v1009_v13 = vld [vmem:[%s1297_s1 + $0x1] ss:$8 sm:$0x3] (!%p166_p2)  ;;  %v223_v16 = vld [vmem:[%s1297_s1] ss:$8 sm:$0x3] (!%p166_p2) }
   0xb   : > { %v593_v17 = vrot.slane (!%p166_p2), %v1026_v12, %v1163_v10  ;;  %v597_v18 = vrot.slane (!%p166_p2), %v1026_v12, %v1165_v11  ;;  %v253_v19 = vrot.slane (!%p166_p2), %v1009_v13, %v1163_v10  ;;  %v257_v20 = vrot.slane (!%p166_p2), %v1009_v13, %v1165_v11  ;;  %v1030_v33 = vld [vmem:[%s1297_s1 + $0x6] ss:$8 sm:$0x3] (!%p166_p2)  ;;  %v1015_v48 = vld [vmem:[%s1297_s1 + $0x2] ss:$8 sm:$0x3] (!%p166_p2) }
   0xc   : > { %vm220_vm4 = vcmp.lt.s32.totalorder (!%p166_p2), %v1161_v9, 17  ;;  %v228_v23 = vrot.slane (!%p166_p2), %v223_v16, %v1163_v10  ;;  %v232_v24 = vrot.slane (!%p166_p2), %v223_v16, %v1165_v11  ;;  %vm662_vm5 = vcmp.lt.s32.totalorder (!%p166_p2), %v1161_v9, 113  ;;  %v1034_v62 = vld [vmem:[%s1297_s1 + $0x7] ss:$8 sm:$0x3] (!%p166_p2) }
   0xd   : > { %s1302_s16 = smov (!%p195_p3, %s999_s16), 1  ;;  %v671_v42 = vrot.slane %v1030_v33, %v1163_v10  ;;  %v675_v43 = vrot.slane %v1030_v33, %v1165_v11  ;;  %vm372_vm6 = vcmp.lt.s32.totalorder %v1161_v9, 15  ;;  %v381_v57 = vrot.slane %v1015_v48, %v1163_v10 }
   0xe   : > { %s1148_s17 = sshll.u32 %s1302_s16, 3  ;;  %v385_v61 = vrot.slane %v1015_v48, %v1165_v11  ;;  %vm740_vm7 = vcmp.lt.s32.totalorder %v1161_v9, 112  ;;  %v753_v13 = vrot.slane %v1034_v62, %v1165_v11  ;;  %vm450_vm8 = vcmp.lt.s32.totalorder %v1161_v9, 1  ;;  %v1016_v48 = vld [vmem:[%s1298_s2 + $0x8] sm:$0xf] }
   0xf   : > { %s199_s20 = scalar_lea.vmem %s1296_s0, %s1148_s17  ;;  %vm818_vm9 = vcmp.lt.s32.totalorder %v1161_v9, 111  ;;  %s204_s16 = scalar_lea.vmem %s1299_s3, %s1148_s17  ;;  %vm902_vm11 = vcmask 15360  }
  0x10   : > { %v210_v1 = vld [vmem:[%s199_s20] sm:$0xff]  ;;  %s208_s20 = scalar_lea.vmem %s1300_s4, %s1148_s17 }
  0x11   : > { %580 = vrot.lane.b32.xlu1 %v210_v1, %s1105_s21  ;;  %240 = vrot.lane.b32.xlu0 %v210_v1, %s1106_s22  ;;  %v212_v2 = vcombine.high %v210_v1, %v210_v1  ;;  %v526_v3 = vpack.c.bf16 %v210_v1, %v210_v1 }
  0x13   : > { %v527_v4 = vpack.c.bf16 %v212_v2, %v212_v2  ;;  %v532_v5 = vsel %vm270_vm0, %v526_v3, 0 }
  0x15   : > { %582 = vrot.lane.b32.xlu1 %v212_v2, %s1105_s21  ;;  %242 = vrot.lane.b32.xlu0 %v212_v2, %s1106_s22 }
  0x16   : > { %1024 = vmatprep.subr.msk.bf16.mxu0 %vm270_vm0, %v527_v4 }
  0x17   : > { %538 = vmatpush1.bf16.msra.mxu0 %v532_v5 }
  0x19   : > { %216 = vrot.lane.b32.xlu1 %v212_v2, %s1107_s25  ;;  %214 = vrot.lane.b32.xlu0 %v210_v1, %s1107_s25 }
  0x1a   : > { %1025 = vmatmul.mubr.msk.bf16.vlgmr.msra.gmra.mrb[0].mxu0 %vm266_vm1, %v1023_v6  ;;  %v749_v6 = vrot.slane %v1034_v62, %v1163_v10 }
  0x1b   : > { %647 = vmatprep.mubr.bf16.mxu0 %v1104_v0 }
  0x1d   : > { %660 = vrot.lane.b32.xlu1 %v212_v2, %s1108_s26  ;;  %658 = vrot.lane.b32.xlu0 %v210_v1, %s1108_s26 }
  0x21   : > { %370 = vrot.lane.b32.xlu1 %v212_v2, %s1109_s27  ;;  %368 = vrot.lane.b32.xlu0 %v210_v1, %s1109_s27 }
  0x25   : > { %738 = vrot.lane.b32.xlu1 %v212_v2, %s1110_s28  ;;  %736 = vrot.lane.b32.xlu0 %v210_v1, %s1110_s28 }
  0x29   : > { %448 = vrot.lane.b32.xlu1 %v212_v2, %s1111_s29  ;;  %446 = vrot.lane.b32.xlu0 %v210_v1, %s1111_s29 }
  0x2d   : > { %816 = vrot.lane.b32.xlu1 %v212_v2, %s1112_s30  ;;  %814 = vrot.lane.b32.xlu0 %v210_v1, %s1112_s30 }
  0x83   : > { %v581_v14 = vpop.permute.xlu1 %580  ;;  %v241_v15 = vpop.permute.xlu0 %240 }
  0x87   : > { %v583_v21 = vpop.permute.xlu1 %582  ;;  %v243_v22 = vpop.permute.xlu0 %242 }
  0x88   : > { %v585_v25 = vsel %vm584_vm2, %v581_v14, %v583_v21  ;;  %v586_v26 = vsel %vm584_vm2, %v583_v21, %v581_v14  ;;  %v245_v27 = vsel %vm244_vm3, %v241_v15, %v243_v22  ;;  %v246_v28 = vsel %vm244_vm3, %v243_v22, %v241_v15  ;;  %v1019_v14 = vld [vmem:[%s1297_s1 + $0x3] ss:$8 sm:$0x3] }
  0x89   : > { %v600_v29 = vmul.f32 %v593_v17, %v585_v25  ;;  %v601_v30 = vmul.f32 %v597_v18, %v586_v26  ;;  %v260_v31 = vmul.f32 %v253_v19, %v246_v28  ;;  %v261_v32 = vmul.f32 %v257_v20, %v245_v27  ;;  %v237_v21 = vld [vmem:[%s1298_s2] sm:$0xf]  ;;  %v1031_v25 = vld [vmem:[%s1298_s2 + $0x18] sm:$0xf] }
  0x8a   : > { %v1038_v26 = vld [vmem:[%s1297_s1 + $0x10] ss:$8 sm:$0x3] }
  0x8b   : > { %v604_v34 = vpack.c.bf16 %v600_v29, %v600_v29  ;;  %v605_v35 = vpack.c.bf16 %v601_v30, %v601_v30  ;;  %v265_v36 = vpack.c.bf16 %v261_v32, %v261_v32  ;;  %v264_v37 = vpack.c.bf16 %v260_v31, %v260_v31  ;;  %v217_v38 = vpop.permute.xlu1 %216  ;;  %v215_v39 = vpop.permute.xlu0 %214 }
  0x8c   : > { %v221_v40 = vsel %vm220_vm4, %v215_v39, %v217_v38  ;;  %v222_v41 = vsel %vm220_vm4, %v217_v38, %v215_v39  ;;  %v459_v31 = vrot.slane %v1019_v14, %v1163_v10  ;;  %v831_v38 = vrot.slane %v1038_v26, %v1165_v11 }
  0x8d   : > { %1011 = vmatprep.subr.msk.bf16.mxu1 %vm270_vm0, %v265_v36  ;;  %1028 = vmatprep.subr.msk.bf16.mxu0 %vm270_vm0, %v605_v35  ;;  %v272_v44 = vsel %vm270_vm0, %v264_v37, 0  ;;  %v610_v45 = vsel %vm270_vm0, %v604_v34, 0  ;;  %v235_v46 = vmul.f32 %v228_v23, %v222_v41  ;;  %v236_v47 = vmul.f32 %v232_v24, %v221_v40 }
  0x8e   : > { %278 = vmatpush1.bf16.msra.mxu1 %v272_v44  ;;  %616 = vmatpush1.bf16.msra.mxu0 %v610_v45  ;;  %v463_v24 = vrot.slane %v1019_v14, %v1165_v11  ;;  %v827_v37 = vrot.slane %v1038_v26, %v1163_v10 }
  0x8f   : > { %v238_v51 = vpack.c.bf16 %v235_v46, %v235_v46  ;;  %v239_v52 = vpack.c.bf16 %v236_v47, %v236_v47  ;;  %v661_v53 = vpop.permute.xlu1 %660  ;;  %v659_v54 = vpop.permute.xlu0 %658 }
  0x90   : > { %v663_v55 = vsel %vm662_vm5, %v659_v54, %v661_v53  ;;  %v664_v56 = vsel %vm662_vm5, %v661_v53, %v659_v54 }
  0x91   : > { %1012 = vmatmul.mubr.msk.bf16.vlgmr.msra.gmra.mrb[0].mxu1 %vm266_vm1, %v1010_v49  ;;  %1029 = vmatmul.mubr.msk.bf16.vlgmr.msra.gmra.mrb[0].mxu0 %vm266_vm1, %v1027_v50  ;;  %v678_v58 = vmul.f32 %v671_v42, %v663_v55  ;;  %v679_v59 = vmul.f32 %v675_v43, %v664_v56  ;;  %v322_v60 = vsel %vm270_vm0, %v238_v51, 0  ;;  %v1035_v49 = vld [vmem:[%s1298_s2 + $0x1c] sm:$0xf]  ;;  %v1020_v51 = vld [vmem:[%s1298_s2 + $0xc] sm:$0xf] }
  0x92   : > { %1013 = vmatprep.subr.msk.bf16.mxu1 %vm270_vm0, %v239_v52  ;;  %359 = vmatprep.mubr.bf16.mxu1 %v1104_v0  ;;  %v1039_v52 = vld [vmem:[%s1298_s2 + $0x20] sm:$0xf] }
  0x93   : > { %v682_v63 = vpack.c.bf16 %v678_v58, %v678_v58  ;;  %v683_v1 = vpack.c.bf16 %v679_v59, %v679_v59  ;;  %328 = vmatpush1.bf16.msra.mxu1 %v322_v60  ;;  %v371_v2 = vpop.permute.xlu1 %370  ;;  %v369_v3 = vpop.permute.xlu0 %368  ;;  %725 = vmatprep.mubr.bf16.mxu0 %v1104_v0 }
  0x94   : > { %v373_v4 = vsel %vm372_vm6, %v369_v3, %v371_v2  ;;  %v374_v5 = vsel %vm372_vm6, %v371_v2, %v369_v3 }
  0x95   : > { %1032 = vmatprep.subr.msk.bf16.mxu0 %vm270_vm0, %v683_v1  ;;  %v688_v7 = vsel %vm270_vm0, %v682_v63, 0  ;;  %v388_v8 = vmul.f32 %v381_v57, %v374_v5  ;;  %v389_v12 = vmul.f32 %v385_v61, %v373_v4 }
  0x96   : > { %694 = vmatpush1.bf16.msra.mxu0 %v688_v7 }
  0x97   : > { %v392_v15 = vpack.c.bf16 %v388_v8, %v388_v8  ;;  %v393_v16 = vpack.c.bf16 %v389_v12, %v389_v12  ;;  %v739_v17 = vpop.permute.xlu1 %738  ;;  %v737_v18 = vpop.permute.xlu0 %736 }
  0x98   : > { %v741_v19 = vsel %vm740_vm7, %v737_v18, %v739_v17  ;;  %v742_v20 = vsel %vm740_vm7, %v739_v17, %v737_v18 }
  0x99   : > { %v756_v22 = vmul.f32 %v749_v6, %v741_v19  ;;  %v757_v23 = vmul.f32 %v753_v13, %v742_v20  ;;  %1017 = vmatprep.subr.msk.bf16.mxu1 %vm270_vm0, %v393_v16  ;;  %v398_v29 = vsel %vm270_vm0, %v392_v15, 0 }
  0x9b   : > { %v760_v27 = vpack.c.bf16 %v756_v22, %v756_v22  ;;  %v761_v28 = vpack.c.bf16 %v757_v23, %v757_v23  ;;  %v449_v30 = vpop.permute.xlu1 %448  ;;  %v447_v32 = vpop.permute.xlu0 %446 }
  0x9c   : > { %v451_v33 = vsel %vm450_vm8, %v447_v32, %v449_v30  ;;  %v452_v34 = vsel %vm450_vm8, %v449_v30, %v447_v32 }
  0x9d   : > { %1014 = vmatmul.mubr.msk.bf16.vlgmr.msra.gmra.mrb[0].mxu1 %vm266_vm1, %v237_v21  ;;  %1033 = vmatmul.mubr.msk.bf16.vlgmr.msra.gmra.mrb[0].mxu0 %vm266_vm1, %v1031_v25  ;;  %v766_v35 = vsel %vm270_vm0, %v760_v27, 0  ;;  %v467_v36 = vmul.f32 %v463_v24, %v451_v33  ;;  %v466_v39 = vmul.f32 %v459_v31, %v452_v34 }
  0x9e   : > { %404 = vmatpush1.bf16.msra.mxu1 %v398_v29  ;;  %1036 = vmatprep.subr.msk.bf16.mxu0 %vm270_vm0, %v761_v28 }
  0x9f   : > { %772 = vmatpush1.bf16.msra.mxu0 %v766_v35  ;;  %v471_v40 = vpack.c.bf16 %v467_v36, %v467_v36  ;;  %435 = vmatprep.mubr.bf16.mxu1 %v1104_v0  ;;  %v817_v41 = vpop.permute.xlu1 %816  ;;  %v815_v42 = vpop.permute.xlu0 %814  ;;  %v470_v45 = vpack.c.bf16 %v466_v39, %v466_v39 }
  0xa0   : > { %803 = vmatprep.mubr.bf16.mxu0 %v1104_v0  ;;  %v819_v43 = vsel %vm818_vm9, %v815_v42, %v817_v41  ;;  %v820_v10 = vsel %vm818_vm9, %v817_v41, %v815_v42 }
  0xa1   : > { %v834_v44 = vmul.f32 %v827_v37, %v819_v43  ;;  %v835_v11 = vmul.f32 %v831_v38, %v820_v10  ;;  %1021 = vmatprep.subr.msk.bf16.mxu1 %vm270_vm0, %v471_v40  ;;  %v476_v9 = vsel %vm270_vm0, %v470_v45, 0 }
  0xa3   : > { %v838_v46 = vpack.c.bf16 %v834_v44, %v834_v44  ;;  %v839_v47 = vpack.c.bf16 %v835_v11, %v835_v11 }
  0xa5   : > { %1040 = vmatprep.subr.msk.bf16.mxu0 %vm270_vm0, %v839_v47  ;;  %v844_v50 = vsel %vm270_vm0, %v838_v46, 0 }
  0xa9   : > { %1018 = vmatmul.mubr.msk.bf16.vlgmr.msra.gmra.mrb[0].mxu1 %vm266_vm1, %v1016_v48  ;;  %1037 = vmatmul.mubr.msk.bf16.vlgmr.msra.gmra.mrb[0].mxu0 %vm266_vm1, %v1035_v49 }
  0xaa   : > { %482 = vmatpush1.bf16.msra.mxu1 %v476_v9  ;;  %850 = vmatpush1.bf16.msra.mxu0 %v844_v50 }
  0xab   : > { %513 = vmatprep.mubr.bf16.mxu1 %v1104_v0  ;;  %881 = vmatprep.mubr.bf16.mxu0 %v1104_v0 }
  0xb5   : > { %1022 = vmatmul.mubr.msk.bf16.vlgmr.msra.gmra.mrb[0].mxu1 %vm266_vm1, %v1020_v51  ;;  %1041 = vmatmul.mubr.msk.bf16.vlgmr.msra.gmra.mrb[0].mxu0 %vm266_vm1, %v1039_v52 }
 0x188   : > { %v515_v53 = vpop.f32.mrb[0].mxu1  ;;  %v883_v54 = vpop.f32.mrb[0].mxu0 }
 0x189   : > { %v1048_v55 = vadd.f32 %v883_v54, %v515_v53  ;;  %v517_v56 = vpop.f32.mrb[1].mxu1  ;;  %v885_v57 = vpop.f32.mrb[1].mxu0 }
 0x18a   : > { %v1049_v58 = vadd.f32 %v885_v57, %v517_v56  ;;  %v519_v0 = vpop.f32.mrb[2].mxu1  ;;  %v887_v59 = vpop.f32.mrb[2].mxu0 }
 0x18b   : > { %v520_v60 = vpop.f32.mrb[3].mxu1  ;;  %v888_v61 = vpop.f32.mrb[3].mxu0  ;;  %v895_v62 = vmul.f32 %v1048_v55, %v1048_v55 }
 0x18c   : > { %v1047_v63 = vpack.c.bf16 %v1049_v58, %v1048_v55  ;;  %v892_v1 = vadd.f32 %v1049_v58, %v1048_v55  ;;  %v896_v2 = vmul.f32 %v1049_v58, %v1049_v58 }
 0x18e   : > { %912 = vst [vmem:[%s204_s16] sm:$0xff] %v1047_v63  ;;  %893 = vadd.xlane.f32.xlu0 %v892_v1  ;;  %v897_v3 = vadd.f32 %v896_v2, %v895_v62 }
 0x190   : > { %898 = vadd.xlane.f32.xlu1 %v897_v3 }
 0x21b   : > { %v894_v4 = vpop.xlane.xlu0 %893 }
 0x21d   : > { %v899_v5 = vpop.xlane.xlu1 %898 }
 0x21e   : > { %v901_v6 = vsel %vm900_vm10, %v894_v4, %v899_v5 }
 0x21f   : > { %903 = vst.msk [vmem:[%s208_s20] sm:$0xff] %vm902_vm11, %v901_v6 }
 0x220 PF: > { %s15_s15 = sadd.s32 1, %s1102_s15  }
 0x221   : > { %p12_p4 = scmp.ge.s32.totalorder %s15_s15, 4  }
 0x223   :  { %14 = sbr.rel (!%p12_p4) target bundleno = 1 (0x1), region = 89 }

// kernel: conv_block_forward.3
= control target key start
LH: loop header
LB: loop body
LE: loop exit
PB: predicated region body
PF: predicated region fallthrough
CT: control target
= control target key end

     0   :  { %s1219_s21 = smov 0   ;;  %s1380_s0 = inlined_call_operand.vmem [shape: bf16[2,8,256], index: 0, kind: input, shape index: {}]   ;;  %s1381_s1 = inlined_call_operand.vmem [shape: f32[8,1], index: 1, kind: input, shape index: {}]   ;;  %s1382_s2 = inlined_call_operand.vmem [shape: f32[8,1], index: 2, kind: input, shape index: {}]   ;;  %s1383_s3 = inlined_call_operand.vmem [shape: f32[9,256], index: 3, kind: input, shape index: {}]   ;;  %s1384_s4 = inlined_call_operand.vmem [shape: bf16[9,8,8], index: 4, kind: input, shape index: {}]   ;;  %s1385_s5 = inlined_call_operand.vmem [shape: bf16[2,8,256], index: 5, kind: output, shape index: {0}]   ;;  %s1386_s6 = inlined_call_operand.vmem [shape: f32[2,8,2], index: 6, kind: output, shape index: {1}]  }
   0x1 LB: > { %s1070_s22 = sadd.s32 4294967295, %s1173_s21   ;;  %p1074_p0 = scmp.ge.s32.totalorder %s1173_s21, 1  ;;  %s1173_s21 = sphi %s1219_s21, %s17_s21  }
   0x2   : > { %p215_p1 = scmp.lt.s32.totalorder %s1173_s21, 3 }
   0x4   : > { %p216_p2 = pnand %p1074_p0, %p215_p1 }
   0x5   : > { %v267_v0 = vld [vmem:[%s1381_s1] sm:$0xff] (!%p216_p2)  ;;  %v1175_v1 = vmov (!%p216_p2), 0   ;;  %p249_p3 = scmp.lt.s32.totalorder (!%p216_p2), %s1070_s22, 1  ;;  %vm341_vm0 = vcmask (!%p216_p2), 1043456   ;;  %s1176_s7 = smov (!%p216_p2), 127   ;;  %vm337_vm1 = vcmask (!%p216_p2), 64512   ;;  %v289_v18 = vlaneseq (!%p216_p2) }
   0x6   : > { %219 = sbr.rel (%p216_p2) target bundleno = 674 (0x2a2), region = 40  ;;  %1166 = vset.pattern.permute.xlu0 (!%p216_p2), %v1175_v1  ;;  %640 = vmatprep.mubr.bf16.mxu0 (!%p216_p2), %v1175_v1  ;;  %v275_v2 = vld [vmem:[%s1382_s2] sm:$0xff] (!%p216_p2)  ;;  %s1177_s8 = smov (!%p216_p2), 16   ;;  %v1094_v17 = vld [vmem:[%s1384_s4 + $0x10] sm:$0xf] (!%p216_p2)  ;;  %vm971_vm10 = vcmask (!%p216_p2), 7168  }
   0x7   : > { %270 = vperm.xlu0 (!%p216_p2), %1166, %v267_v0   ;;  %380 = vmatprep.mubr.bf16.mxu1 (!%p216_p2), %v1175_v1  ;;  %s1178_s11 = smov (!%p216_p2), 17   ;;  %s1179_s12 = smov (!%p216_p2), 113   ;;  %v297_v19 = vshrl.u32 (!%p216_p2), %v289_v18, 7  ;;  %v1249_v20 = vand.u32 (!%p216_p2), 127, %v289_v18  ;;  %v1081_v50 = vld [vmem:[%s1384_s4 + $0x4] sm:$0xf] (!%p216_p2) }
   0x8   : > { %s1180_s13 = smov (!%p216_p2), 15   ;;  %s1181_s14 = smov (!%p216_p2), 112   ;;  %v1080_v23 = vld [vmem:[%s1383_s3 + $0x1] ss:$8 sm:$0x3] (!%p216_p2)  ;;  %vm973_vm11 = vcmask (!%p216_p2), 15360  }
   0x9   : > { %s1182_s15 = smov (!%p216_p2), 1   ;;  %s1183_s16 = smov (!%p216_p2), 111   ;;  %v1251_v21 = vsub.s32 (!%p216_p2), 0, %v297_v19  ;;  %v1253_v22 = vsub.s32 (!%p216_p2), 1, %v297_v19  ;;  %vm315_vm2 = vcmp.lt.s32.totalorder (!%p216_p2), %v1249_v20, 16  ;;  %vm655_vm3 = vcmp.lt.s32.totalorder (!%p216_p2), %v1249_v20, 127 }
   0xa   : > { %v1097_v28 = vld [vmem:[%s1383_s3 + $0x5] ss:$8 sm:$0x3] (!%p216_p2)  ;;  %v294_v37 = vld [vmem:[%s1383_s3] ss:$8 sm:$0x3] (!%p216_p2) }
   0xb   : > { %278 = vperm.xlu0 (!%p216_p2), %1166, %v275_v2   ;;  %v324_v26 = vrot.slane (!%p216_p2), %v1080_v23, %v1251_v21  ;;  %v328_v27 = vrot.slane (!%p216_p2), %v1080_v23, %v1253_v22  ;;  %v664_v34 = vrot.slane (!%p216_p2), %v1097_v28, %v1251_v21  ;;  %v668_v35 = vrot.slane (!%p216_p2), %v1097_v28, %v1253_v22  ;;  %v1101_v49 = vld [vmem:[%s1383_s3 + $0x6] ss:$8 sm:$0x3] (!%p216_p2)  ;;  %v1086_v62 = vld [vmem:[%s1383_s3 + $0x2] ss:$8 sm:$0x3] (!%p216_p2) }
   0xc   : > { %vm291_vm4 = vcmp.lt.s32.totalorder (!%p216_p2), %v1249_v20, 17  ;;  %v299_v44 = vrot.slane (!%p216_p2), %v294_v37, %v1251_v21  ;;  %v303_v48 = vrot.slane (!%p216_p2), %v294_v37, %v1253_v22  ;;  %vm733_vm5 = vcmp.lt.s32.totalorder (!%p216_p2), %v1249_v20, 113  ;;  %v1098_v63 = vld [vmem:[%s1384_s4 + $0x14] sm:$0xf] (!%p216_p2) }
   0xd   : > { %s1388_s22 = smov (!%p249_p3, %s1070_s22), 1  ;;  %v742_v56 = vrot.slane %v1101_v49, %v1251_v21  ;;  %v746_v61 = vrot.slane %v1101_v49, %v1253_v22  ;;  %vm443_vm6 = vcmp.lt.s32.totalorder %v1249_v20, 15  ;;  %vm811_vm7 = vcmp.lt.s32.totalorder %v1249_v20, 112 }
   0xe   : > { %s1236_s27 = sshll.u32 %s1388_s22, 3  ;;  %vm521_vm8 = vcmp.lt.s32.totalorder %v1249_v20, 1  ;;  %vm889_vm9 = vcmp.lt.s32.totalorder %v1249_v20, 111 }
   0xf   : > { %s253_s30 = scalar_lea.vmem %s1380_s0, %s1236_s27  ;;  %s262_s10 = scalar_lea.vmem %s1386_s6, %s1236_s27 }
  0x10   : > { %v264_v3 = vld [vmem:[%s253_s30] sm:$0xff] }
  0x11   : > { %v265_v4 = vunpack.c.l.bf16 %v264_v3  ;;  %v266_v5 = vunpack.c.h.bf16 %v264_v3 }
  0x86   : > { %v271_v6 = vpop.permute.xlu0 %270 }
  0x87   : > { %v273_v7 = vmul.f32 %v271_v6, %v265_v4  ;;  %v274_v8 = vmul.f32 %v271_v6, %v266_v5  ;;  %v452_v6 = vrot.slane %v1086_v62, %v1251_v21 }
  0x8a   : > { %v279_v9 = vpop.permute.xlu0 %278 }
  0x8b   : > { %v281_v10 = vadd.f32 %v279_v9, %v273_v7  ;;  %v282_v11 = vadd.f32 %v279_v9, %v274_v8 }
  0x8d   : > { %v283_v12 = vmax.f32 %v281_v10, 0.0  ;;  %v284_v13 = vmax.f32 %v282_v11, 0.0  ;;  %v456_v10 = vrot.slane %v1086_v62, %v1253_v22  ;;  %v1105_v11 = vld [vmem:[%s1383_s3 + $0x7] ss:$8 sm:$0x3] }
  0x8e   : > { %v820_v18 = vrot.slane %v1105_v11, %v1251_v21  ;;  %v1091_v62 = vld [vmem:[%s1384_s4 + $0xc] sm:$0xf] }
  0x8f   : > { %651 = vrot.lane.b32.xlu0 %v283_v12, %s1176_s7  ;;  %311 = vrot.lane.b32.xlu1 %v283_v12, %s1177_s8  ;;  %v598_v14 = vpack.c.bf16 %v284_v13, %v284_v13  ;;  %v597_v15 = vpack.c.bf16 %v283_v12, %v283_v12 }
  0x91   : > { %1095 = vmatprep.subr.msk.bf16.mxu0 %vm341_vm0, %v598_v14  ;;  %v603_v16 = vsel %vm341_vm0, %v597_v15, 0 }
  0x92   : > { %609 = vmatpush1.bf16.msra.mxu0 %v603_v16 }
  0x93   : > { %285 = vrot.lane.b32.xlu0 %v283_v12, %s1178_s11  ;;  %313 = vrot.lane.b32.xlu1 %v284_v13, %s1177_s8 }
  0x95   : > { %1096 = vmatmul.mubr.msk.bf16.vlgmr.msra.gmra.mrb[0].mxu0 %vm337_vm1, %v1094_v17 }
  0x96   : > { %718 = vmatprep.mubr.bf16.mxu0 %v1175_v1 }
  0x97   : > { %729 = vrot.lane.b32.xlu0 %v283_v12, %s1179_s12  ;;  %653 = vrot.lane.b32.xlu1 %v284_v13, %s1176_s7  ;;  %s258_s7 = scalar_lea.vmem %s1385_s5, %s1236_s27 }
  0x9b   : > { %439 = vrot.lane.b32.xlu0 %v283_v12, %s1180_s13  ;;  %287 = vrot.lane.b32.xlu1 %v284_v13, %s1178_s11 }
  0x9f   : > { %807 = vrot.lane.b32.xlu0 %v283_v12, %s1181_s14  ;;  %731 = vrot.lane.b32.xlu1 %v284_v13, %s1179_s12 }
  0xa3   : > { %517 = vrot.lane.b32.xlu0 %v283_v12, %s1182_s15  ;;  %441 = vrot.lane.b32.xlu1 %v284_v13, %s1180_s13 }
  0xa7   : > { %885 = vrot.lane.b32.xlu0 %v283_v12, %s1183_s16  ;;  %809 = vrot.lane.b32.xlu1 %v284_v13, %s1181_s14 }
  0xab   : > { %519 = vrot.lane.b32.xlu1 %v284_v13, %s1182_s15 }
  0xaf   : > { %887 = vrot.lane.b32.xlu1 %v284_v13, %s1183_s16 }
 0x101   : > { %v652_v24 = vpop.permute.xlu0 %651  ;;  %v312_v25 = vpop.permute.xlu1 %311 }
 0x105   : > { %v286_v29 = vpop.permute.xlu0 %285  ;;  %v314_v30 = vpop.permute.xlu1 %313 }
 0x106   : > { %v316_v31 = vsel %vm315_vm2, %v312_v25, %v314_v30  ;;  %v317_v32 = vsel %vm315_vm2, %v314_v30, %v312_v25  ;;  %v824_v25 = vrot.slane %v1105_v11, %v1253_v22 }
 0x107   : > { %v331_v33 = vmul.f32 %v324_v26, %v317_v32  ;;  %v332_v36 = vmul.f32 %v328_v27, %v316_v31  ;;  %v1090_v26 = vld [vmem:[%s1383_s3 + $0x3] ss:$8 sm:$0x3] }
 0x108   : > { %v308_v27 = vld [vmem:[%s1384_s4] sm:$0xf] }
 0x109   : > { %v730_v38 = vpop.permute.xlu0 %729  ;;  %v654_v39 = vpop.permute.xlu1 %653  ;;  %v336_v40 = vpack.c.bf16 %v332_v36, %v332_v36  ;;  %v335_v41 = vpack.c.bf16 %v331_v33, %v331_v33  ;;  %v530_v33 = vrot.slane %v1090_v26, %v1251_v21 }
 0x10a   : > { %v656_v42 = vsel %vm655_vm3, %v652_v24, %v654_v39  ;;  %v657_v43 = vsel %vm655_vm3, %v654_v39, %v652_v24  ;;  %v1109_v39 = vld [vmem:[%s1383_s3 + $0x10] ss:$8 sm:$0x3] }
 0x10b   : > { %v671_v45 = vmul.f32 %v664_v34, %v656_v42  ;;  %v672_v46 = vmul.f32 %v668_v35, %v657_v43  ;;  %1082 = vmatprep.subr.msk.bf16.mxu1 %vm341_vm0, %v336_v40  ;;  %v343_v47 = vsel %vm341_vm0, %v335_v41, 0  ;;  %v1102_v40 = vld [vmem:[%s1384_s4 + $0x18] sm:$0xf] }
 0x10c   : > { %349 = vmatpush1.bf16.msra.mxu1 %v343_v47 }
 0x10d   : > { %v675_v51 = vpack.c.bf16 %v671_v45, %v671_v45  ;;  %v676_v52 = vpack.c.bf16 %v672_v46, %v672_v46  ;;  %v288_v53 = vpop.permute.xlu1 %287  ;;  %v440_v57 = vpop.permute.xlu0 %439  ;;  %v898_v46 = vrot.slane %v1109_v39, %v1251_v21 }
 0x10e   : > { %v292_v54 = vsel %vm291_vm4, %v286_v29, %v288_v53  ;;  %v293_v55 = vsel %vm291_vm4, %v288_v53, %v286_v29 }
 0x10f   : > { %v306_v58 = vmul.f32 %v299_v44, %v293_v55  ;;  %v307_v59 = vmul.f32 %v303_v48, %v292_v54  ;;  %1083 = vmatmul.mubr.msk.bf16.vlgmr.msra.gmra.mrb[0].mxu1 %vm337_vm1, %v1081_v50  ;;  %1099 = vmatprep.subr.msk.bf16.mxu0 %vm341_vm0, %v676_v52  ;;  %v681_v60 = vsel %vm341_vm0, %v675_v51, 0  ;;  %v902_v50 = vrot.slane %v1109_v39, %v1253_v22 }
 0x110   : > { %687 = vmatpush1.bf16.msra.mxu0 %v681_v60  ;;  %430 = vmatprep.mubr.bf16.mxu1 %v1175_v1  ;;  %v1106_v60 = vld [vmem:[%s1384_s4 + $0x1c] sm:$0xf] }
 0x111   : > { %v309_v0 = vpack.c.bf16 %v306_v58, %v306_v58  ;;  %v310_v2 = vpack.c.bf16 %v307_v59, %v307_v59  ;;  %v732_v3 = vpop.permute.xlu1 %731  ;;  %v808_v12 = vpop.permute.xlu0 %807 }
 0x112   : > { %v734_v4 = vsel %vm733_vm5, %v730_v38, %v732_v3  ;;  %v735_v5 = vsel %vm733_vm5, %v732_v3, %v730_v38  ;;  %v534_v38 = vrot.slane %v1090_v26, %v1253_v22 }
 0x113   : > { %v749_v7 = vmul.f32 %v742_v56, %v734_v4  ;;  %v750_v8 = vmul.f32 %v746_v61, %v735_v5  ;;  %1084 = vmatprep.subr.msk.bf16.mxu1 %vm341_vm0, %v310_v2  ;;  %1100 = vmatmul.mubr.msk.bf16.vlgmr.msra.gmra.mrb[0].mxu0 %vm337_vm1, %v1098_v63  ;;  %v393_v9 = vsel %vm341_vm0, %v309_v0, 0  ;;  %v1110_v63 = vld [vmem:[%s1384_s4 + $0x20] sm:$0xf] }
 0x114   : > { %399 = vmatpush1.bf16.msra.mxu1 %v393_v9  ;;  %796 = vmatprep.mubr.bf16.mxu0 %v1175_v1 }
 0x115   : > { %v753_v13 = vpack.c.bf16 %v749_v7, %v749_v7  ;;  %v754_v14 = vpack.c.bf16 %v750_v8, %v750_v8  ;;  %v442_v15 = vpop.permute.xlu1 %441  ;;  %v518_v34 = vpop.permute.xlu0 %517 }
 0x116   : > { %v444_v16 = vsel %vm443_vm6, %v440_v57, %v442_v15  ;;  %v445_v17 = vsel %vm443_vm6, %v442_v15, %v440_v57  ;;  %v1087_v57 = vld [vmem:[%s1384_s4 + $0x8] sm:$0xf] }
 0x117   : > { %v459_v19 = vmul.f32 %v452_v6, %v445_v17  ;;  %v460_v23 = vmul.f32 %v456_v10, %v444_v16  ;;  %1103 = vmatprep.subr.msk.bf16.mxu0 %vm341_vm0, %v754_v14  ;;  %v759_v24 = vsel %vm341_vm0, %v753_v13, 0 }
 0x118   : > { %765 = vmatpush1.bf16.msra.mxu0 %v759_v24 }
 0x119   : > { %v463_v28 = vpack.c.bf16 %v459_v19, %v459_v19  ;;  %v464_v29 = vpack.c.bf16 %v460_v23, %v460_v23  ;;  %v810_v30 = vpop.permute.xlu1 %809  ;;  %v886_v51 = vpop.permute.xlu0 %885 }
 0x11a   : > { %v812_v31 = vsel %vm811_vm7, %v808_v12, %v810_v30  ;;  %v813_v32 = vsel %vm811_vm7, %v810_v30, %v808_v12 }
 0x11b   : > { %v827_v35 = vmul.f32 %v820_v18, %v812_v31  ;;  %v828_v36 = vmul.f32 %v824_v25, %v813_v32  ;;  %1085 = vmatmul.mubr.msk.bf16.vlgmr.msra.gmra.mrb[0].mxu1 %vm337_vm1, %v308_v27  ;;  %1088 = vmatprep.subr.msk.bf16.mxu1 %vm341_vm0, %v464_v29  ;;  %v469_v37 = vsel %vm341_vm0, %v463_v28, 0 }
 0x11c   : > { %475 = vmatpush1.bf16.msra.mxu1 %v469_v37  ;;  %506 = vmatprep.mubr.bf16.mxu1 %v1175_v1 }
 0x11d   : > { %v831_v41 = vpack.c.bf16 %v827_v35, %v827_v35  ;;  %v832_v42 = vpack.c.bf16 %v828_v36, %v828_v36  ;;  %v520_v43 = vpop.permute.xlu1 %519 }
 0x11e   : > { %v522_v44 = vsel %vm521_vm8, %v518_v34, %v520_v43  ;;  %v523_v45 = vsel %vm521_vm8, %v520_v43, %v518_v34 }
 0x11f   : > { %v537_v47 = vmul.f32 %v530_v33, %v523_v45  ;;  %v538_v48 = vmul.f32 %v534_v38, %v522_v44  ;;  %1104 = vmatmul.mubr.msk.bf16.vlgmr.msra.gmra.mrb[0].mxu0 %vm337_vm1, %v1102_v40  ;;  %1107 = vmatprep.subr.msk.bf16.mxu0 %vm341_vm0, %v832_v42  ;;  %v837_v49 = vsel %vm341_vm0, %v831_v41, 0 }
 0x120   : > { %843 = vmatpush1.bf16.msra.mxu0 %v837_v49  ;;  %874 = vmatprep.mubr.bf16.mxu0 %v1175_v1 }
 0x121   : > { %v542_v52 = vpack.c.bf16 %v538_v48, %v538_v48  ;;  %v888_v53 = vpop.permute.xlu1 %887  ;;  %v541_v55 = vpack.c.bf16 %v537_v47, %v537_v47 }
 0x122   : > { %v890_v54 = vsel %vm889_vm9, %v886_v51, %v888_v53  ;;  %v891_v20 = vsel %vm889_vm9, %v888_v53, %v886_v51 }
 0x123   : > { %v905_v21 = vmul.f32 %v898_v46, %v890_v54  ;;  %v906_v56 = vmul.f32 %v902_v50, %v891_v20  ;;  %1092 = vmatprep.subr.msk.bf16.mxu1 %vm341_vm0, %v542_v52  ;;  %v547_v22 = vsel %vm341_vm0, %v541_v55, 0 }
 0x125   : > { %v910_v58 = vpack.c.bf16 %v906_v56, %v906_v56  ;;  %v909_v59 = vpack.c.bf16 %v905_v21, %v905_v21 }
 0x127   : > { %1089 = vmatmul.mubr.msk.bf16.vlgmr.msra.gmra.mrb[0].mxu1 %vm337_vm1, %v1087_v57  ;;  %1111 = vmatprep.subr.msk.bf16.mxu0 %vm341_vm0, %v910_v58  ;;  %v915_v61 = vsel %vm341_vm0, %v909_v59, 0 }
 0x128   : > { %553 = vmatpush1.bf16.msra.mxu1 %v547_v22  ;;  %584 = vmatprep.mubr.bf16.mxu1 %v1175_v1 }
 0x12b   : > { %1108 = vmatmul.mubr.msk.bf16.vlgmr.msra.gmra.mrb[0].mxu0 %vm337_vm1, %v1106_v60 }
 0x12c   : > { %921 = vmatpush1.bf16.msra.mxu0 %v915_v61  ;;  %952 = vmatprep.mubr.bf16.mxu0 %v1175_v1 }
 0x133   : > { %1093 = vmatmul.mubr.msk.bf16.vlgmr.msra.gmra.mrb[0].mxu1 %vm337_vm1, %v1091_v62 }
 0x137   : > { %1112 = vmatmul.mubr.msk.bf16.vlgmr.msra.gmra.mrb[0].mxu0 %vm337_vm1, %v1110_v63 }
 0x206   : > { %v586_v0 = vpop.f32.mrb[0].mxu1 }
 0x207   : > { %v588_v2 = vpop.f32.mrb[1].mxu1 }
 0x208   : > { %v590_v3 = vpop.f32.mrb[2].mxu1 }
 0x209   : > { %v591_v4 = vpop.f32.mrb[3].mxu1 }
 0x20a   : > { %v954_v5 = vpop.f32.mrb[0].mxu0 }
 0x20b   : > { %v1119_v6 = vadd.f32 %v954_v5, %v586_v0  ;;  %v956_v1 = vpop.f32.mrb[1].mxu0 }
 0x20c   : > { %v1120_v7 = vadd.f32 %v956_v1, %v588_v2  ;;  %v958_v8 = vpop.f32.mrb[2].mxu0 }
 0x20d   : > { %v959_v9 = vpop.f32.mrb[3].mxu0  ;;  %v966_v10 = vmul.f32 %v1119_v6, %v1119_v6 }
 0x20e   : > { %v1118_v11 = vpack.c.bf16 %v1120_v7, %v1119_v6  ;;  %v963_v12 = vadd.f32 %v1120_v7, %v1119_v6  ;;  %v967_v13 = vmul.f32 %v1120_v7, %v1120_v7 }
 0x210   : > { %983 = vst [vmem:[%s258_s7] sm:$0xff] %v1118_v11  ;;  %964 = vadd.xlane.f32.xlu0 %v963_v12  ;;  %v968_v14 = vadd.f32 %v967_v13, %v966_v10 }
 0x212   : > { %969 = vadd.xlane.f32.xlu1 %v968_v14 }
 0x29d   : > { %v965_v15 = vpop.xlane.xlu0 %964 }
 0x29f   : > { %v970_v16 = vpop.xlane.xlu1 %969 }
 0x2a0   : > { %v972_v17 = vsel %vm971_vm10, %v965_v15, %v970_v16 }
 0x2a1   : > { %974 = vst.msk [vmem:[%s262_s10] sm:$0xff] %vm973_vm11, %v972_v17 }
 0x2a2 PF: > { %s17_s21 = sadd.s32 1, %s1173_s21  }
 0x2a3   : > { %p14_p4 = scmp.ge.s32.totalorder %s17_s21, 4  }
 0x2a5   :  { %16 = sbr.rel (!%p14_p4) target bundleno = 1 (0x1), region = 97 }

</bundles_post_ra>
